<compile_context>
chip_gen: v7x
topology: tpu7x:2x2x1
jax: 0.10.0
libtpu: 0.0.40
codegen_flags: <defaults>
</compile_context>

<pallas_src>
import functools

import jax
import jax.numpy as jnp
from jax.experimental import pallas as pl
from jax.experimental.pallas import tpu as pltpu

HIDDEN_SIZE = 64
INPUT_SIZE = 784
NUM_CLASSES = 10

H_PAD = 128      # hidden padded to one full lane group (zero-padded cols are inert)
OUT_PAD = 128    # lane-dense output block (unmasked stores); sliced to 10 outside

MAX_TILE_B = 2048        # v7x-safe with fp32 x double-buffering (~13 MB) + bf16 out
SPLIT_THRESHOLD_B = 1024  # ensure >= 2 grid steps for sizable batches (v7x dual-TC)
VMEM_LIMIT_BYTES = 48 * 1024 * 1024


def mlp_kernel(x_ref, w1_ref, b1_ref, w2_ref, b2_ref, o_ref):
    # fc1: fp32 x is cast to bf16 in-kernel (VPU op, hidden under DMA), MXU accumulates fp32.
    x_bf16 = x_ref[...].astype(jnp.bfloat16)                       # (TB, 784)
    h = jnp.dot(x_bf16, w1_ref[...], preferred_element_type=jnp.float32)  # (TB, 128)
    h = jnp.maximum(h + b1_ref[...], 0.0)                          # bias + ReLU, fp32
    # fc2: fully fp32 (tiny matmul, compute has huge slack) -> better accuracy.
    out = jnp.dot(h, w2_ref[...], preferred_element_type=jnp.float32)     # (TB, 128)
    o_ref[...] = (out + b2_ref[...]).astype(o_ref.dtype)           # lane-dense bf16 store


def _cdiv(a, b):
    return (a + b - 1) // b


def _round_up(x, m):
    return ((x + m - 1) // m) * m


def prepare_params(w1, b1, w2, b2):
    """One-time weight prep (hoisted out of the per-call hot path).
    w1: (784, 64), b1: (64,), w2: (64, 10), b2: (10,)  [stored (in, out), i.e. x @ W].
    Returns lane-dense padded params: w1 bf16 (784,128), b1 f32 (1,128),
    w2 f32 (128,128), b2 f32 (1,128)."""
    w1_p = jnp.zeros((INPUT_SIZE, H_PAD), jnp.bfloat16)
    w1_p = w1_p.at[:, :HIDDEN_SIZE].set(w1.astype(jnp.bfloat16))
    b1_p = jnp.zeros((1, H_PAD), jnp.float32)
    b1_p = b1_p.at[:, :HIDDEN_SIZE].set(b1.reshape(1, HIDDEN_SIZE).astype(jnp.float32))
    w2_p = jnp.zeros((H_PAD, OUT_PAD), jnp.float32)
    w2_p = w2_p.at[:HIDDEN_SIZE, :NUM_CLASSES].set(w2.astype(jnp.float32))
    b2_p = jnp.zeros((1, OUT_PAD), jnp.float32)
    b2_p = b2_p.at[:, :NUM_CLASSES].set(b2.reshape(1, NUM_CLASSES).astype(jnp.float32))
    return w1_p, b1_p, w2_p, b2_p


def _mlp_pallas(x2d, w1_p, b1_p, w2_p, b2_p):
    """x2d: fp32 (B, 784). Returns bf16 (B_k, OUT_PAD) with B_k >= B."""
    B = x2d.shape[0]

    # Tile chosen from B so batch-padding waste stays bounded; split >= 2 ways for
    # large batches so the "parallel" grid axis can shard across both v7x TCs.
    n_tiles = max(1, _cdiv(B, MAX_TILE_B))
    if n_tiles == 1 and B >= SPLIT_THRESHOLD_B:
        n_tiles = 2
    tb = _round_up(_cdiv(B, n_tiles), 8)   # sublane alignment

    if B < tb:
        # Tiny batch only: pad rows so the single block meets the sublane rule.
        x_in = jnp.pad(x2d, ((0, tb - B), (0, 0)))
        b_k = tb
    else:
        # No padding copy: Pallas handles the ragged last block; garbage rows read
        # past B only affect output rows >= B, whose writes are masked / dropped.
        x_in = x2d
        b_k = B

    n_steps = _cdiv(b_k, tb)

    flops = 2 * b_k * INPUT_SIZE * H_PAD + 2 * b_k * H_PAD * OUT_PAD
    bytes_accessed = (x_in.size * 4 + w1_p.size * 2 + b1_p.size * 4
                      + w2_p.size * 4 + b2_p.size * 4 + b_k * OUT_PAD * 2)
    cost = pl.CostEstimate(flops=flops, transcendentals=0,
                           bytes_accessed=bytes_accessed)

    return pl.pallas_call(
        mlp_kernel,
        out_shape=jax.ShapeDtypeStruct((b_k, OUT_PAD), jnp.bfloat16),
        grid_spec=pltpu.PrefetchScalarGridSpec(
            num_scalar_prefetch=0,
            grid=(n_steps,),
            in_specs=[
                # x streamed per batch tile; last block dim == full array dim (784)
                pl.BlockSpec((tb, INPUT_SIZE), lambda i: (i, 0)),
                pl.BlockSpec((INPUT_SIZE, H_PAD), lambda i: (0, 0)),   # w1 resident
                pl.BlockSpec((1, H_PAD), lambda i: (0, 0)),            # b1 resident
                pl.BlockSpec((H_PAD, OUT_PAD), lambda i: (0, 0)),      # w2 resident
                pl.BlockSpec((1, OUT_PAD), lambda i: (0, 0)),          # b2 resident
            ],
            out_specs=pl.BlockSpec((tb, OUT_PAD), lambda i: (i, 0)),
        ),
        compiler_params=pltpu.CompilerParams(
            dimension_semantics=("parallel",),
            vmem_limit_bytes=VMEM_LIMIT_BYTES),
        cost_estimate=cost,
    )(x_in, w1_p, b1_p, w2_p, b2_p)


@jax.jit
def mlp_1_forward(x, w1_p, b1_p, w2_p, b2_p):
    """x: any shape flattening to 784 per row (e.g. NCHW (B, 1, 28, 28)), matching
    torch's x.view(-1, 784).  Params must come from prepare_params().
    Returns fp32 (B, 10)."""
    x2d = x.reshape(-1, INPUT_SIZE).astype(jnp.float32)
    B = x2d.shape[0]
    if B == 0:  # degenerate batch: avoid a zero-size pallas_call
        return jnp.zeros((0, NUM_CLASSES), jnp.float32)
    out_padded = _mlp_pallas(x2d, w1_p, b1_p, w2_p, b2_p)
    # Drop batch padding / ragged tail and the lane padding; cast logits back to fp32.
    return out_padded[:B, :NUM_CLASSES].astype(jnp.float32)


def init_params(key):
    """Deterministic init mirroring torch.nn.Linear's uniform(-1/sqrt(in), 1/sqrt(in)).
    Weights stored as (in, out) so the kernel computes x @ W."""
    k1, k2, k3, k4 = jax.random.split(key, 4)
    bound1 = 1.0 / jnp.sqrt(INPUT_SIZE)
    bound2 = 1.0 / jnp.sqrt(HIDDEN_SIZE)
    w1 = jax.random.uniform(k1, (INPUT_SIZE, HIDDEN_SIZE), jnp.float32, -bound1, bound1)
    b1 = jax.random.uniform(k2, (HIDDEN_SIZE,), jnp.float32, -bound1, bound1)
    w2 = jax.random.uniform(k3, (HIDDEN_SIZE, NUM_CLASSES), jnp.float32, -bound2, bound2)
    b2 = jax.random.uniform(k4, (NUM_CLASSES,), jnp.float32, -bound2, bound2)
    return w1, b1, w2, b2


if __name__ == "__main__":
    key = jax.random.PRNGKey(0)
    kx, kp = jax.random.split(key)

    # NCHW input like an MNIST batch: (2, 1, 28, 28) -> view(-1, 784)
    x = jax.random.normal(kx, (2, 1, 28, 28), dtype=jnp.float32)
    w1, b1, w2, b2 = init_params(kp)

    # One-time weight prep (hoisted out of the per-call hot path).
    params = prepare_params(w1, b1, w2, b2)
    params = jax.tree_util.tree_map(jax.block_until_ready, params)

    out = mlp_1_forward(x, *params)
    jax.block_until_ready(out)

    # Pure-JAX fp32 reference (fc1 uses bf16 x/w1 in the kernel -> loosened tolerance).
    x2d = x.reshape(-1, INPUT_SIZE)
    ref = jnp.maximum(x2d @ w1 + b1[None, :], 0.0) @ w2 + b2[None, :]
    assert out.shape == (2, NUM_CLASSES)
    assert jnp.allclose(out, ref, atol=5e-2, rtol=5e-2), (
        f"max abs err {jnp.max(jnp.abs(out - ref))}")

    print("KERNEL_OK")
</pallas_src>

<mosaic_0001>
module attributes {stable_mosaic.version = 11 : i64} {
  func.func @mlp_kernel(%arg0: i32, %arg1: memref<8x784xf32, #tpu.memory_space<vmem>>, %arg2: memref<784x128xbf16, #tpu.memory_space<vmem>>, %arg3: memref<1x128xf32, #tpu.memory_space<vmem>>, %arg4: memref<128x128xf32, #tpu.memory_space<vmem>>, %arg5: memref<1x128xf32, #tpu.memory_space<vmem>>, %arg6: memref<8x128xbf16, #tpu.memory_space<vmem>>) attributes {dimension_semantics = [#tpu.dimension_semantics<parallel>], iteration_bounds = array<i64: 1>, scalar_prefetch = 0 : i64, scratch_operands = 0 : i64, tpu.core_type = #tpu.core_type<tc>, window_params = [{transform_indices = @transform_0, window_bounds = array<i64: 8, 784>}, {pipeline_mode = #tpu.pipeline_mode<synchronous>, transform_indices = @transform_1, window_bounds = array<i64: 784, 128>}, {pipeline_mode = #tpu.pipeline_mode<synchronous>, transform_indices = @transform_2, window_bounds = array<i64: 1, 128>}, {pipeline_mode = #tpu.pipeline_mode<synchronous>, transform_indices = @transform_3, window_bounds = array<i64: 128, 128>}, {pipeline_mode = #tpu.pipeline_mode<synchronous>, transform_indices = @transform_4, window_bounds = array<i64: 1, 128>}, {transform_indices = @transform_5, window_bounds = array<i64: 8, 128>}]} {
    %c0 = arith.constant 0 : index
    %c0_0 = arith.constant 0 : index
    %0 = vector.load %arg1[%c0, %c0_0] : memref<8x784xf32, #tpu.memory_space<vmem>>, vector<8x784xf32>
    %1 = arith.truncf %0 : vector<8x784xf32> to vector<8x784xbf16>
    %c0_1 = arith.constant 0 : index
    %c0_2 = arith.constant 0 : index
    %2 = vector.load %arg2[%c0_1, %c0_2] : memref<784x128xbf16, #tpu.memory_space<vmem>>, vector<784x128xbf16>
    %cst = arith.constant dense<0.000000e+00> : vector<8x128xf32>
    %3 = tpu.matmul %1, %2, %cst {dimension_numbers = #tpu.dot_dimension_numbers<[1], [0], [0], [1], [0, 0, 1, 1], [], []>} : vector<8x784xbf16>, vector<784x128xbf16>, vector<8x128xf32> -> vector<8x128xf32>
    %c0_3 = arith.constant 0 : index
    %c0_4 = arith.constant 0 : index
    %4 = vector.load %arg3[%c0_3, %c0_4] : memref<1x128xf32, #tpu.memory_space<vmem>>, vector<1x128xf32>
    %5 = vector.broadcast %4 : vector<1x128xf32> to vector<8x128xf32>
    %6 = arith.addf %3, %5 : vector<8x128xf32>
    %cst_5 = arith.constant 0.000000e+00 : f32
    %7 = vector.broadcast %cst_5 : f32 to vector<8x128xf32>
    %8 = arith.maximumf %6, %7 : vector<8x128xf32>
    %c0_6 = arith.constant 0 : index
    %c0_7 = arith.constant 0 : index
    %9 = vector.load %arg4[%c0_6, %c0_7] : memref<128x128xf32, #tpu.memory_space<vmem>>, vector<128x128xf32>
    %cst_8 = arith.constant dense<0.000000e+00> : vector<8x128xf32>
    %10 = tpu.matmul %8, %9, %cst_8 {dimension_numbers = #tpu.dot_dimension_numbers<[1], [0], [0], [1], [0, 0, 1, 1], [], []>} : vector<8x128xf32>, vector<128x128xf32>, vector<8x128xf32> -> vector<8x128xf32>
    %c0_9 = arith.constant 0 : index
    %c0_10 = arith.constant 0 : index
    %11 = vector.load %arg5[%c0_9, %c0_10] : memref<1x128xf32, #tpu.memory_space<vmem>>, vector<1x128xf32>
    %12 = vector.broadcast %11 : vector<1x128xf32> to vector<8x128xf32>
    %13 = arith.addf %10, %12 : vector<8x128xf32>
    %14 = arith.truncf %13 : vector<8x128xf32> to vector<8x128xbf16>
    %c0_11 = arith.constant 0 : index
    %c0_12 = arith.constant 0 : index
    %15 = vector.load %arg6[%c0_11, %c0_12] : memref<8x128xbf16, #tpu.memory_space<vmem>>, vector<8x128xbf16>
    tpu.vector_store %arg6[%c0_11, %c0_12], %14 {strides = array<i32>} : memref<8x128xbf16, #tpu.memory_space<vmem>>, vector<8x128xbf16>,
    return
  }
  func.func @transform_0(%arg0: i32) -> (i32, i32) {
    %c0_i32 = arith.constant 0 : i32
    %c0_i32_0 = arith.constant 0 : i32
    return %arg0, %c0_i32 : i32, i32
  }
  func.func @transform_1(%arg0: i32) -> (i32, i32) {
    %c0_i32 = arith.constant 0 : i32
    %c0_i32_0 = arith.constant 0 : i32
    %c0_i32_1 = arith.constant 0 : i32
    return %c0_i32, %c0_i32_0 : i32, i32
  }
  func.func @transform_2(%arg0: i32) -> (i32, i32) {
    %c0_i32 = arith.constant 0 : i32
    %c0_i32_0 = arith.constant 0 : i32
    %c0_i32_1 = arith.constant 0 : i32
    return %c0_i32, %c0_i32_0 : i32, i32
  }
  func.func @transform_3(%arg0: i32) -> (i32, i32) {
    %c0_i32 = arith.constant 0 : i32
    %c0_i32_0 = arith.constant 0 : i32
    %c0_i32_1 = arith.constant 0 : i32
    return %c0_i32, %c0_i32_0 : i32, i32
  }
  func.func @transform_4(%arg0: i32) -> (i32, i32) {
    %c0_i32 = arith.constant 0 : i32
    %c0_i32_0 = arith.constant 0 : i32
    %c0_i32_1 = arith.constant 0 : i32
    return %c0_i32, %c0_i32_0 : i32, i32
  }
  func.func @transform_5(%arg0: i32) -> (i32, i32) {
    %c0_i32 = arith.constant 0 : i32
    %c0_i32_0 = arith.constant 0 : i32
    return %arg0, %c0_i32 : i32, i32
  }
}

</mosaic_0001>

<bundles_post_ra>
// kernel: mlp_1_forward.1
= control target key start
LH: loop header
LB: loop body
LE: loop exit
PB: predicated region body
PF: predicated region fallthrough
CT: control target
= control target key end

     0   :  { %10 = vsyncpa [#allocation3], 0  ;;  %s994_s18 = smov [#allocation2]   ;;  %s1122_s0 = inlined_call_operand.vmem [shape: f32[8,784], index: 0, kind: input, shape index: {}]   ;;  %s1123_s1 = inlined_call_operand.hbm [shape: bf16[784,128], index: 1, kind: input, shape index: {}]   ;;  %s1124_s2 = inlined_call_operand.vmem [shape: f32[1,128], index: 2, kind: input, shape index: {}]   ;;  %s1125_s3 = inlined_call_operand.vmem [shape: f32[128,128], index: 3, kind: input, shape index: {}]   ;;  %s1126_s4 = inlined_call_operand.vmem [shape: f32[1,128], index: 4, kind: input, shape index: {}]   ;;  %s1127_s5 = inlined_call_operand.vmem [shape: bf16[8,128], index: 5, kind: output, shape index: {}]  }
   0x1   :  { %s18_s19 = sshll.u32 %s994_s18, 4  ;;  %s970_s22 = scalar_lea.hbm %s1123_s1, 6272  ;;  %s19_s19 = int_to_ptr.vmem [resolvable:$true] %s18_s19 }
   0x2   :  { %p971_p0 = scmp.ne.s32.totalorder %s1123_s1, %s970_s22  ;;  %p974_p1 = scmp.lt.u32.totalorder %s970_s22, %s1123_s1 }
   0x4   :  { %p976_p2 = pnand %p974_p1, %p971_p0 }
   0x6   :  { %979 = shalt.err (!%p976_p2)
}
   0x7   :  { %s980_s27 = scalar_lea.vmem %s19_s19, 6272  ;;  %p985_p4 = scmp.lt.s32.totalorder %s19_s19, %s19_s19 }
   0x8   :  { %p981_p3 = scmp.ne.s32.totalorder %s19_s19, %s980_s27  ;;  %p986_p5 = scmp.lt.s32.totalorder %s980_s27, %s980_s27 }
   0xa   :  { %p987_p6 = por %p986_p5, %p985_p4 }
   0xc   :  { %p988_p7 = pnand %p987_p6, %p981_p3 }
   0xe   :  { %991 = shalt.err (!%p988_p7)
}
   0xf   :  { %s995_s28 = smov 64   ;;  %s996_s29 = smov 4  }
  0x10   :  { %24 = dma.hbm_to_vmem [thread:$0]  %s1123_s1, 6272, %s19_s19, [#allocation3], %s995_s28, %s995_s28, %s996_s29  }
  0x11   :  { %992 = dma.done.wait [#allocation3], 6272  }
  0x12   :  { %993 = vsyncadd [#allocation3], 4294961024  ;;  %v921_v0 = vld [vmem:[#allocation2 + $0x40] sm:$0xff]   ;;  %v925_v4 = vld [vmem:[#allocation2 + $0x48] sm:$0xff]   ;;  %v997_v44 = vmov 0.0   ;;  %vm998_vm0 = vmmov 0  }
  0x13   :  { %v922_v1 = vld [vmem:[#allocation2] sm:$0xff]   ;;  %765 = vmatprep.subr.bf16.mxu0 %v921_v0  ;;  %v926_v5 = vld [vmem:[#allocation2 + $0x8] sm:$0xff]   ;;  %v929_v8 = vld [vmem:[#allocation2 + $0x50] sm:$0xff]   ;;  %vm448_vm1 = vcmask 130048  }
  0x14   :  { %v923_v2 = vld [vmem:[#allocation2 + $0xc0] sm:$0xff]   ;;  %766 = vmatpush3.bf16.msra.mxu0 %v922_v1  ;;  %v927_v6 = vld [vmem:[#allocation2 + $0xc8] sm:$0xff]   ;;  %v930_v9 = vld [vmem:[#allocation2 + $0x10] sm:$0xff]  }
  0x15   :  { %v924_v3 = vld [vmem:[#allocation2 + $0x80] sm:$0xff]   ;;  %787 = vmatprep.subr.bf16.mxu1 %v923_v2  ;;  %767 = vmatprep.subr.bf16.mxu0 %v925_v4  ;;  %v928_v7 = vld [vmem:[#allocation2 + $0x88] sm:$0xff]   ;;  %v931_v10 = vld [vmem:[#allocation2 + $0xd0] sm:$0xff]  }
  0x16   :  { %788 = vmatpush3.bf16.msra.mxu1 %v924_v3  ;;  %v932_v11 = vld [vmem:[#allocation2 + $0x90] sm:$0xff]   ;;  %v933_v12 = vld [vmem:[#allocation2 + $0x58] sm:$0xff]   ;;  %v937_v16 = vld [vmem:[#allocation2 + $0x60] sm:$0xff]   ;;  %v999_v3 = vmov 0.0|0.0  }
  0x17   :  { %789 = vmatprep.subr.bf16.mxu1 %v927_v6  ;;  %v934_v13 = vld [vmem:[#allocation2 + $0x18] sm:$0xff]   ;;  %v938_v17 = vld [vmem:[#allocation2 + $0x20] sm:$0xff]   ;;  %v941_v20 = vld [vmem:[#allocation2 + $0x68] sm:$0xff]  }
  0x18   :  { %768 = vmatpush3.bf16.msra.mxu0 %v926_v5  ;;  %v935_v14 = vld [vmem:[#allocation2 + $0xd8] sm:$0xff]   ;;  %v939_v18 = vld [vmem:[#allocation2 + $0xe0] sm:$0xff]   ;;  %v942_v21 = vld [vmem:[#allocation2 + $0x28] sm:$0xff]  }
  0x19   :  { %769 = vmatprep.subr.bf16.mxu0 %v929_v8  ;;  %v936_v15 = vld [vmem:[#allocation2 + $0x98] sm:$0xff]   ;;  %v940_v19 = vld [vmem:[#allocation2 + $0xa0] sm:$0xff]   ;;  %v943_v22 = vld [vmem:[#allocation2 + $0xe8] sm:$0xff]  }
  0x1a   :  { %790 = vmatpush3.bf16.msra.mxu1 %v928_v7  ;;  %v944_v23 = vld [vmem:[#allocation2 + $0xa8] sm:$0xff]   ;;  %v945_v24 = vld [vmem:[#allocation2 + $0x70] sm:$0xff]   ;;  %v949_v28 = vld [vmem:[#allocation2 + $0x78] sm:$0xff]  }
  0x1b   :  { %791 = vmatprep.subr.bf16.mxu1 %v931_v10  ;;  %v946_v25 = vld [vmem:[#allocation2 + $0x30] sm:$0xff]   ;;  %v950_v29 = vld [vmem:[#allocation2 + $0x38] sm:$0xff]   ;;  %v36_v31 = vld [vmem:[%s1122_s0 + $0x8] sm:$0xff] }
  0x1c   :  { %770 = vmatpush3.bf16.msra.mxu0 %v930_v9  ;;  %v947_v26 = vld [vmem:[#allocation2 + $0xf0] sm:$0xff]   ;;  %v951_v30 = vld [vmem:[#allocation2 + $0xf8] sm:$0xff]   ;;  %v43_v32 = vpack.c.bf16 %v36_v31, %v36_v31  ;;  %v35_v34 = vld [vmem:[%s1122_s0] sm:$0xff] }
  0x1d   :  { %771 = vmatprep.subr.bf16.mxu0 %v933_v12  ;;  %v948_v27 = vld [vmem:[#allocation2 + $0xb0] sm:$0xff]   ;;  %v952_v33 = vld [vmem:[#allocation2 + $0xb8] sm:$0xff]   ;;  %v42_v35 = vpack.c.bf16 %v35_v34, %v35_v34  ;;  %v953_v36 = vld [vmem:[#allocation2 + $0x140] sm:$0xff]  }
  0x1e   :  { %792 = vmatpush3.bf16.msra.mxu1 %v932_v11  ;;  %v38_v37 = vld [vmem:[%s1122_s0 + $0x18] sm:$0xff]  ;;  %484 = vmatprep.mubr.bf16.mxu0 %v43_v32  ;;  %v954_v39 = vld [vmem:[#allocation2 + $0x100] sm:$0xff]   ;;  %v37_v40 = vld [vmem:[%s1122_s0 + $0x10] sm:$0xff] }
  0x1f   :  { %793 = vmatprep.subr.bf16.mxu1 %v935_v14  ;;  %v45_v38 = vpack.c.bf16 %v38_v37, %v38_v37  ;;  %v44_v41 = vpack.c.bf16 %v37_v40, %v37_v40  ;;  %v955_v42 = vld [vmem:[#allocation2 + $0x148] sm:$0xff]   ;;  %v957_v45 = vld [vmem:[#allocation2 + $0x150] sm:$0xff]   ;;  %v959_v47 = vld [vmem:[#allocation2 + $0x158] sm:$0xff]  }
  0x20   :  { %772 = vmatpush3.bf16.msra.mxu0 %v934_v13  ;;  %v956_v43 = vld [vmem:[#allocation2 + $0x108] sm:$0xff]   ;;  %v958_v46 = vld [vmem:[#allocation2 + $0x110] sm:$0xff]   ;;  %v960_v48 = vld [vmem:[#allocation2 + $0x118] sm:$0xff]  }
  0x21   :  { %773 = vmatprep.subr.bf16.mxu0 %v937_v16  ;;  %524 = vmatprep.mubr.bf16.mxu1 %v45_v38  ;;  %v961_v49 = vld [vmem:[#allocation2 + $0x160] sm:$0xff]   ;;  %v963_v51 = vld [vmem:[#allocation2 + $0x168] sm:$0xff]   ;;  %v41_v55 = vld [vmem:[%s1122_s0 + $0x30] sm:$0xff] }
  0x22   :  { %794 = vmatpush3.bf16.msra.mxu1 %v936_v15  ;;  %v962_v50 = vld [vmem:[#allocation2 + $0x120] sm:$0xff]   ;;  %v40_v53 = vld [vmem:[%s1122_s0 + $0x28] sm:$0xff]  ;;  %v48_v57 = vpack.c.bf16 %v41_v55, %v41_v55  ;;  %v965_v58 = vld [vmem:[#allocation2 + $0x170] sm:$0xff]  }
  0x23   :  { %795 = vmatprep.subr.bf16.mxu1 %v939_v18  ;;  %v969_v52 = vld [vmem:[#allocation2 + $0x180] sm:$0xff]   ;;  %v47_v54 = vpack.c.bf16 %v40_v53, %v40_v53  ;;  %v964_v56 = vld [vmem:[#allocation2 + $0x128] sm:$0xff]   ;;  %v966_v59 = vld [vmem:[#allocation2 + $0x130] sm:$0xff]  }
  0x24   :  { %774 = vmatpush3.bf16.msra.mxu0 %v938_v17  ;;  %v967_v60 = vld [vmem:[#allocation2 + $0x178] sm:$0xff]   ;;  %v39_v62 = vld [vmem:[%s1122_s0 + $0x20] sm:$0xff]  ;;  %v614_v1 = vld [vmem:[%s1125_s3 + $0x8] sm:$0xff] }
  0x25   :  { %775 = vmatprep.subr.bf16.mxu0 %v941_v20  ;;  %v968_v61 = vld [vmem:[#allocation2 + $0x138] sm:$0xff]   ;;  %v46_v63 = vpack.c.bf16 %v39_v62, %v39_v62  ;;  %v613_v0 = vld [vmem:[%s1125_s3] sm:$0xff]  ;;  %v615_v2 = vld [vmem:[%s1125_s3 + $0x10] sm:$0xff] }
  0x26   :  { %796 = vmatpush3.bf16.msra.mxu1 %v940_v19  ;;  %v892_v4 = vpack.c.bf16 %v614_v1, %v613_v0  ;;  %v616_v5 = vld [vmem:[%s1125_s3 + $0x18] sm:$0xff]  ;;  %v617_v7 = vld [vmem:[%s1125_s3 + $0x20] sm:$0xff]  ;;  %v618_v8 = vld [vmem:[%s1125_s3 + $0x28] sm:$0xff] }
  0x27   :  { %797 = vmatprep.subr.bf16.mxu1 %v943_v22  ;;  %v895_v6 = vpack.c.bf16 %v616_v5, %v615_v2  ;;  %v898_v9 = vpack.c.bf16 %v618_v8, %v617_v7  ;;  %v619_v10 = vld [vmem:[%s1125_s3 + $0x30] sm:$0xff]  ;;  %v620_v11 = vld [vmem:[%s1125_s3 + $0x38] sm:$0xff]  ;;  %v621_v13 = vld [vmem:[%s1125_s3 + $0x40] sm:$0xff] }
  0x28   :  { %776 = vmatpush3.bf16.msra.mxu0 %v942_v21  ;;  %v901_v12 = vpack.c.bf16 %v620_v11, %v619_v10  ;;  %v622_v14 = vld [vmem:[%s1125_s3 + $0x48] sm:$0xff]  ;;  %v623_v16 = vld [vmem:[%s1125_s3 + $0x50] sm:$0xff]  ;;  %v624_v17 = vld [vmem:[%s1125_s3 + $0x58] sm:$0xff] }
  0x29   :  { %777 = vmatprep.subr.bf16.mxu0 %v945_v24  ;;  %v904_v15 = vpack.c.bf16 %v622_v14, %v621_v13  ;;  %v907_v18 = vpack.c.bf16 %v624_v17, %v623_v16  ;;  %v625_v19 = vld [vmem:[%s1125_s3 + $0x60] sm:$0xff]  ;;  %v626_v20 = vld [vmem:[%s1125_s3 + $0x68] sm:$0xff]  ;;  %v627_v22 = vld [vmem:[%s1125_s3 + $0x70] sm:$0xff] }
  0x2a   :  { %798 = vmatpush3.bf16.msra.mxu1 %v944_v23  ;;  %v910_v21 = vpack.c.bf16 %v626_v20, %v625_v19  ;;  %v628_v23 = vld [vmem:[%s1125_s3 + $0x78] sm:$0xff] }
  0x2b   :  { %799 = vmatprep.subr.bf16.mxu1 %v947_v26  ;;  %v913_v24 = vpack.c.bf16 %v628_v23, %v627_v22  ;;  %v713_v26 = vld [vmem:[%s1124_s2] ss:$0 sm:$0xff] }
  0x2c   :  { %778 = vmatpush3.bf16.msra.mxu0 %v946_v25 }
  0x2d   :  { %779 = vmatprep.subr.bf16.mxu0 %v949_v28 }
  0x2e   :  { %800 = vmatpush3.bf16.msra.mxu1 %v948_v27 }
  0x2f   :  { %801 = vmatprep.subr.bf16.mxu1 %v951_v30 }
  0x30   :  { %780 = vmatpush3.bf16.msra.mxu0 %v950_v29 }
  0x31   :  { %809 = vmatprep.subr.bf16.mxu0 %v953_v36 }
  0x32   :  { %802 = vmatpush3.bf16.msra.mxu1 %v952_v33 }
  0x33   :  { %485 = vmatmul.mubr.bf16.vlgmr.msra.gmra.mrb[0].mxu0 %v42_v35  ;;  %850 = vmatprep.subr.bf16.mxu1 %v997_v44 }
  0x34   :  { %810 = vmatpush3.bf16.msra.mxu0 %v954_v39  ;;  %564 = vmatprep.mubr.bf16.mxu0 %v47_v54 }
  0x35   :  { %525 = vmatmul.mubr.bf16.vlgmr.msra.gmra.mrb[0].mxu1 %v44_v41  ;;  %811 = vmatprep.subr.bf16.mxu0 %v955_v42 }
  0x36   :  { %852 = vmatprep.mubr.msk.bf16.mxu1 %vm998_vm0, %v997_v44  ;;  %851 = vmatpush3.bf16.msra.mxu1 %v969_v52 }
  0x37   :  { %891 = vmatprep.subr.bf16.mxu1 %v999_v3 }
  0x38   :  { %812 = vmatpush3.bf16.msra.mxu0 %v956_v43 }
  0x39   :  { %813 = vmatprep.subr.bf16.mxu0 %v957_v45 }
  0x3c   :  { %814 = vmatpush3.bf16.msra.mxu0 %v958_v46 }
  0x3d   :  { %815 = vmatprep.subr.bf16.mxu0 %v959_v47  ;;  %853 = vmatmul.mubr.msk.bf16.vlgmr.msra.gmra.mrb[4].mxu1 %vm448_vm1, %v48_v57 }
  0x3e   :  { %888 = vmatprep.mubr.msk.f32.mxu1 %vm998_vm0, %v997_v44  ;;  %893 = vmatpush3.bf16.msra.mxu1 %v892_v4 }
  0x3f   :  { %894 = vmatprep.subr.bf16.mxu1 %v999_v3 }
  0x40   :  { %816 = vmatpush3.bf16.msra.mxu0 %v960_v48 }
  0x41   :  { %817 = vmatprep.subr.bf16.mxu0 %v961_v49 }
  0x42   :  { %896 = vmatpush3.bf16.msra.mxu1 %v895_v6 }
  0x43   :  { %897 = vmatprep.subr.bf16.mxu1 %v999_v3 }
  0x44   :  { %818 = vmatpush3.bf16.msra.mxu0 %v962_v50  ;;  %v764_v50 = vld [vmem:[%s1126_s4] ss:$0 sm:$0xff] }
  0x45   :  { %819 = vmatprep.subr.bf16.mxu0 %v963_v51 }
  0x46   :  { %899 = vmatpush3.bf16.msra.mxu1 %v898_v9 }
  0x47   :  { %900 = vmatprep.subr.bf16.mxu1 %v999_v3 }
  0x48   :  { %820 = vmatpush3.bf16.msra.mxu0 %v964_v56 }
  0x49   :  { %821 = vmatprep.subr.bf16.mxu0 %v965_v58 }
  0x4a   :  { %902 = vmatpush3.bf16.msra.mxu1 %v901_v12 }
  0x4b   :  { %903 = vmatprep.subr.bf16.mxu1 %v999_v3 }
  0x4c   :  { %822 = vmatpush3.bf16.msra.mxu0 %v966_v59 }
  0x4d   :  { %823 = vmatprep.subr.bf16.mxu0 %v967_v60 }
  0x4e   :  { %905 = vmatpush3.bf16.msra.mxu1 %v904_v15 }
  0x4f   :  { %906 = vmatprep.subr.bf16.mxu1 %v999_v3 }
  0x50   :  { %824 = vmatpush3.bf16.msra.mxu0 %v968_v61 }
  0x52   :  { %908 = vmatpush3.bf16.msra.mxu1 %v907_v18 }
  0x53   :  { %565 = vmatmul.mubr.bf16.vlgmr.msra.gmra.mrb[4].mxu0 %v46_v63  ;;  %909 = vmatprep.subr.bf16.mxu1 %v999_v3 }
  0x56   :  { %911 = vmatpush3.bf16.msra.mxu1 %v910_v21 }
  0x57   :  { %912 = vmatprep.subr.bf16.mxu1 %v999_v3 }
  0x5a   :  { %914 = vmatpush3.bf16.msra.mxu1 %v913_v24 }
 0x106   :  { %v781_v25 = vpop.f32.mrb[0].mxu0 }
 0x107   :  { %v782_v27 = vpop.f32.mrb[1].mxu0 }
 0x108   :  { %v783_v28 = vadd.f32 %v782_v27, %v781_v25  ;;  %v784_v29 = vpop.f32.mrb[2].mxu0  ;;  %v803_v30 = vpop.f32.mrb[0].mxu1 }
 0x109   :  { %v785_v31 = vpop.f32.mrb[3].mxu0  ;;  %v804_v33 = vpop.f32.mrb[1].mxu1 }
 0x10a   :  { %v487_v32 = vadd.f32 %v783_v28, %v713_v26  ;;  %v805_v34 = vadd.f32 %v804_v33, %v803_v30  ;;  %v806_v35 = vpop.f32.mrb[2].mxu1 }
 0x10b   :  { %v807_v36 = vpop.f32.mrb[3].mxu1 }
 0x10c   :  { %v527_v37 = vadd.f32 %v805_v34, %v487_v32 }
 0x110   :  { %v606_v38 = vpop.f32.mrb[4].mxu1 }
 0x111   :  { %v854_v39 = vpop.f32.mrb[5].mxu1 }
 0x112   :  { %v609_v40 = vpop.f32.mrb[6].mxu1 }
 0x113   :  { %v855_v41 = vpop.f32.mrb[7].mxu1 }
 0x126   :  { %v825_v42 = vpop.f32.mrb[4].mxu0 }
 0x127   :  { %v826_v43 = vpop.f32.mrb[5].mxu0 }
 0x128   :  { %v827_v44 = vadd.f32 %v826_v43, %v825_v42  ;;  %v828_v45 = vpop.f32.mrb[6].mxu0 }
 0x129   :  { %v829_v46 = vpop.f32.mrb[7].mxu0 }
 0x12a   :  { %v567_v47 = vadd.f32 %v827_v44, %v527_v37 }
 0x12c   :  { %v607_v48 = vadd.f32 %v606_v38, %v567_v47 }
 0x12e   :  { %v612_v49 = vmax.f32 %v607_v48, 0.0 }
 0x130   :  { %889 = vmatmul.mubr.f32.vlgmr.msra.gmra.mrb[8].mxu1 %v612_v49 }
 0x203   :  { %v702_v51 = vpop.f32.mrb[8].mxu1 }
 0x204   :  { %v703_v52 = vadd.f32 %v764_v50, %v702_v51  ;;  %v890_v53 = vpop.f32.mrb[9].mxu1 }
 0x206   :  { %v706_v54 = vpack.c.bf16 %v703_v52, %v703_v52 }
 0x208   :  { %707 = vst [vmem:[%s1127_s5] sm:$0xf] %v706_v54 }
 0x209   :  { %712 = vsyncpa [#allocation3], 1 }

</bundles_post_ra>
